<compile_context>
chip_gen: v7x
topology: tpu7x:2x2x1
jax: 0.10.0
libtpu: 0.0.40
codegen_flags: <defaults>
</compile_context>

<pallas_src>
from collections import defaultdict

import numpy as np
import jax
import jax.numpy as jnp
from jax.experimental import pallas as pl
from jax.experimental.pallas import tpu as pltpu

_LANE = 128   # layers / mp shards padded onto the 128-lane axis
_SUB = 8      # pipeline stages / stage boundaries padded onto the 8-sublane axis


def _round_up(x, m):
    return ((int(x) + m - 1) // m) * m


# ----------------------------------------------------------------------------
# Fused Pallas kernel: cost_e row, cost_c table, dp-side max — one launch.
# ----------------------------------------------------------------------------
def _fused_cost_kernel(mpavg_ref,                      # SMEM (B,)  mean-over-dp mp_avg
                       base_ref, coeff_ref, vol_ref,   # VMEM (1, LANE)
                       invbw_ref,                      # VMEM (SUB, 1)  mean-over-dp 1/bw
                       dpc_ref,                        # VMEM (SUB, LANE)
                       pcount_ref,                     # VMEM (SUB, 1)
                       cost_e_ref,                     # VMEM (1, LANE)
                       cost_c_ref,                     # VMEM (SUB, LANE)
                       maxdp_ref):                     # VMEM (1, 1)
    b = pl.program_id(0)
    m = mpavg_ref[b]                                   # scalar read from SMEM
    # cost_e[l] = base[l] + coeff[l] * mean_dp(mp_avg)      (dp-mean hoisted to host)
    cost_e_ref[...] = base_ref[...] + coeff_ref[...] * m
    # cost_c[j, k] = mean_dp(1/bw)[j] * layer_volume[k]     (lane-dense output, layers last)
    cost_c_ref[...] = invbw_ref[...] * vol_ref[...]
    # max_dp = max(0, max_{pp, mp} dp_const * param_count)  (padding is 0, clamp keeps it safe)
    prod = jnp.maximum(dpc_ref[...] * pcount_ref[...], 0.0)
    maxdp_ref[...] = jnp.max(prod, axis=(0, 1), keepdims=True)


@jax.jit
def _fused_costs(mpavg, base, coeff, vol, invbw, dpc, pcount):
    batch, _, lane = base.shape
    sub = dpc.shape[1]

    def row_spec(rows):
        return pl.BlockSpec((None, rows, lane), lambda b: (b, 0, 0))

    def col_spec(rows):
        return pl.BlockSpec((None, rows, 1), lambda b: (b, 0, 0))

    return pl.pallas_call(
        _fused_cost_kernel,
        grid=(batch,),
        in_specs=[
            pl.BlockSpec(memory_space=pltpu.MemorySpace.SMEM),  # mpavg: whole (B,) in SMEM
            row_spec(1),      # base
            row_spec(1),      # coeff
            row_spec(1),      # vol
            col_spec(sub),    # invbw
            row_spec(sub),    # dp_const
            col_spec(sub),    # pcount
        ],
        out_specs=(
            row_spec(1),      # cost_e
            row_spec(sub),    # cost_c
            col_spec(1),      # max_dp
        ),
        out_shape=(
            jax.ShapeDtypeStruct((batch, 1, lane), jnp.float32),
            jax.ShapeDtypeStruct((batch, sub, lane), jnp.float32),
            jax.ShapeDtypeStruct((batch, 1, 1), jnp.float32),
        ),
        compiler_params=pltpu.CompilerParams(
            dimension_semantics=("parallel",)),   # v7x: configs shard across both TCs
    )(mpavg, base, coeff, vol, invbw, dpc, pcount)


# ----------------------------------------------------------------------------
# Scalar glue (rank maps, cluster topology walks) -- mirrors the torch code
# ----------------------------------------------------------------------------
def axis2rank(axis, mp_deg, dp_deg, pp_deg):
    # Standard AMP rank layout: rank = mp + mp_deg*dp + mp_deg*dp_deg*pp
    pp_i, dp_i, mp_i = axis
    return int(mp_i + int(mp_deg) * dp_i + int(mp_deg) * int(dp_deg) * pp_i)


def _build_layer_list(n_layers):
    return ['embed2h', 'noop'] + ['transformer_layer'] * int(n_layers) + \
           ['noop', 'noop', 'embed2v', 'noop']


class AMPPallas:
    """JAX/Pallas port of the AMP cost model module."""

    def __init__(self, model_config, exp_name, placement=False):
        self.model_config = model_config
        self.model_type = model_config['type']
        self.placement = placement
        assert self.model_type in ['gpt2', 'gpt3']
        self.exp_name = exp_name
        self._last_cost_e = None
        self._last_cost_c = None
        self.init_param()

    def init_param(self):
        # TODO(synk): the torch module loads profiled per-layer costs from .npy files;
        # here they are generated deterministically in-script.
        n = int(self.model_config['num_layers'])
        num_layer = n + 6
        key = jax.random.PRNGKey(0)
        self.profile_cost = {}
        for idx, mp_size in enumerate([1, 2, 4]):
            k = jax.random.fold_in(key, idx)
            cur = 3.0 * jax.random.uniform(k, (num_layer,), dtype=jnp.float32)
            self.profile_cost[str(mp_size)] = np.asarray(cur)

    # -------------------------------------------------------- host prep: cost_e
    def _cost_e_host(self, cluster_info, model_config, parallel_config, placement):
        h = float(model_config['hidden_size'])
        s = float(model_config['sequence_length'])
        n = int(model_config['num_layers'])
        v = float(model_config['vocab_size'])
        bs = float(parallel_config['micro_bs'])
        rank_node_map = parallel_config['rank_node_map']
        mp = float(parallel_config['mp'])
        dp = float(parallel_config['dp'])
        pp = float(parallel_config['pp'])
        profile_cost = self.profile_cost

        _layer = _build_layer_list(n)
        NL = len(_layer)
        assert NL == len(profile_cost['1'])

        mp_avgs = []
        for i in range(int(dp)):
            mp_avg = 0.0
            if placement:
                for j in range(int(pp)):
                    slowest = float('inf')
                    connectivity = float('inf')
                    for k in range(int(mp)):
                        rank_cur = axis2rank((j, i, k), mp, dp, pp)
                        node_cur = rank_node_map[rank_cur]
                        rank_next = axis2rank((j, i, (k + 1) % int(mp)), mp, dp, pp)
                        node_next = rank_node_map[rank_next]
                        if node_cur == node_next:
                            connectivity = cluster_info[node_cur][1]
                        else:
                            connectivity = min(cluster_info[node_cur][0],
                                               cluster_info[node_next][0])
                    slowest = min(slowest, connectivity)  # matches reference indentation
                    mp_avg += 2 * (mp - 1) / (mp * slowest)
            mp_avgs.append(mp_avg)
        # Algebraic hoist of the dp-mean: mean_i(base + coeff*a_i) == base + coeff*mean(a_i)
        mpavg_mean = float(np.mean(np.asarray(mp_avgs, dtype=np.float64)))

        base = np.zeros((NL,), dtype=np.float32)
        coeff = np.zeros((NL,), dtype=np.float32)
        for lid, ltype in enumerate(_layer):
            if placement:
                base[lid] = bs * float(profile_cost['1'][lid]) / mp
            else:
                base[lid] = bs * float(profile_cost[str(int(mp))][lid])
            if ltype == 'embed2v':
                coeff[lid] = v * h / mp
            elif ltype == 'transformer_layer':
                coeff[lid] = 7 * h ** 2 / mp + 2 * bs * s * h
        return base, coeff, np.float32(mpavg_mean), NL

    # -------------------------------------------------------- host prep: cost_c
    def _cost_c_host(self, cluster_info, model_config, parallel_config):
        h = float(model_config['hidden_size'])
        s = float(model_config['sequence_length'])
        n = int(model_config['num_layers'])
        v = float(model_config['vocab_size'])
        bs = float(parallel_config['micro_bs'])
        rank_node_map = parallel_config['rank_node_map']
        mp = float(parallel_config['mp'])
        dp = float(parallel_config['dp'])
        pp = float(parallel_config['pp'])

        _layer = _build_layer_list(n)
        NL = len(_layer)

        layer_volume = []
        last_volume = 0.0
        for ltype in _layer:
            if ltype in ('embed2h', 'transformer_layer'):
                last_volume = bs * s * h
            elif ltype == 'embed2v':
                last_volume = bs * s * v / mp
            layer_volume.append(last_volume)
        vol = np.asarray(layer_volume[:NL - 1], dtype=np.float32)

        # mean over dp of 1/slowest_bw, hoisted to host: mean_i(vol/bw_i) = vol*mean_i(1/bw_i)
        ppb = int(pp) - 1
        inv_bw = np.zeros((int(dp), ppb), dtype=np.float64)
        for i in range(int(dp)):
            for j in range(ppb):
                slowest_bandwidth = np.inf
                for k in range(int(mp)):
                    rank_cur = axis2rank((j, i, k), mp, dp, pp)
                    rank_peer = axis2rank((j + 1, i, k), mp, dp, pp)
                    node_cur = rank_node_map[rank_cur]
                    node_peer = rank_node_map[rank_peer]
                    if node_cur != node_peer:
                        cur_bandwidth = min(cluster_info[node_cur][0],
                                            cluster_info[node_peer][0])
                    else:
                        cur_bandwidth = cluster_info[node_cur][1]
                    if cur_bandwidth < slowest_bandwidth:
                        slowest_bandwidth = cur_bandwidth
                inv_bw[i, j] = 1.0 / slowest_bandwidth
        if ppb > 0:
            invbw_mean = inv_bw.mean(axis=0).astype(np.float32)
        else:
            invbw_mean = np.zeros((0,), dtype=np.float32)
        return vol, invbw_mean

    # -------------------------------------------------------- host prep: dp cost
    def _dp_host(self, cluster_info, model_config, parallel_config, partition):
        h = float(model_config['hidden_size'])
        n = int(model_config['num_layers'])
        v = float(model_config['vocab_size'])
        rank_node_map = parallel_config['rank_node_map']
        mp = float(parallel_config['mp'])
        dp = float(parallel_config['dp'])
        pp = float(parallel_config['pp'])

        _layer = _build_layer_list(n)
        NL = len(_layer)

        ds_partition = [0]
        for p in partition:
            ds_partition.append(ds_partition[-1] + p)
        assert ds_partition[-1] == NL
        assert len(ds_partition) == int(pp) + 1

        dp_const = np.zeros((int(pp), int(mp)), dtype=np.float32)
        pcount = np.zeros((int(pp),), dtype=np.float32)
        for i in range(int(pp)):
            param_count = 0.0
            counted = False
            for layer_id in range(ds_partition[i], ds_partition[i + 1]):
                ltype = _layer[layer_id]
                if ltype in ('embed2h', 'embed2v'):
                    if not counted:
                        counted = True
                        param_count += h * v / mp
                elif ltype == 'transformer_layer':
                    param_count += 12 * h ** 2 / mp
            pcount[i] = param_count

            for j in range(int(mp)):
                slowest = float('inf')
                connectivity = float('inf')
                for k in range(int(dp)):
                    rank_cur = axis2rank((i, k, j), mp, dp, pp)
                    node_cur = rank_node_map[rank_cur]
                    rank_next = axis2rank((i, (k + 1) % int(dp), j), mp, dp, pp)
                    node_next = rank_node_map[rank_next]
                    if node_cur == node_next:
                        connectivity = cluster_info[node_cur][1]
                    else:
                        connectivity = min(cluster_info[node_cur][0],
                                           cluster_info[node_next][0])
                slowest = min(slowest, connectivity)  # matches reference indentation
                dp_const[i, j] = 2 * (dp - 1) / (dp * slowest)
        return dp_const, pcount, ds_partition

    # -------------------------------------------------------- per-config preparation
    @staticmethod
    def _pipe_uniform(L, pp):
        base = L // pp
        partition = [base] * pp
        for r in range(L % pp):
            partition[r] += 1
        partition[0] += 2
        partition[-1] += 4
        return partition

    def _prepare_single(self, config, bs, mbs, cluster_info, model_config, oth):
        L = int(model_config['num_layers'])
        config = np.asarray(config)
        M, N = config.shape

        if np.all(config == -1):
            rank_map = defaultdict(list)
            rank_node_map = dict()
            m = float(oth['mp_deg'])
            n_dp = float(oth['dp_deg'])
            pp = float(oth['pp_deg'])
            counter = 0
            for j in range(N):
                for k in range(M):
                    rank_map[j].append(counter)
                    rank_node_map[counter] = j
                    counter += 1
        else:
            pp = float(np.max(config))
            rank_map = defaultdict(list)
            rank_node_map = dict()
            if pp >= L + 2:
                return None                     # early return -> inf cost
            m = float(oth['mp_deg'])
            n_dp = float(oth['dp_deg'])
            assert pp == float(oth['pp_deg'])
            rank_counter = np.zeros(int(pp))
            for j in range(N):
                for k in range(M):
                    cur_pp = int(config[k][j] - 1)
                    r = int(rank_counter[cur_pp] + cur_pp * m * n_dp)
                    rank_map[j].append(r)
                    rank_node_map[r] = j
                    rank_counter[cur_pp] += 1

        B = bs / (n_dp * mbs)
        parallel_config = {'mp': m, 'dp': n_dp, 'pp': pp, 'micro_bs': float(mbs),
                           'rank_map': rank_map, 'rank_node_map': rank_node_map}

        base, coeff, mpavg_mean, NL = self._cost_e_host(
            cluster_info, model_config, parallel_config, self.placement)
        vol, invbw_mean = self._cost_c_host(cluster_info, model_config, parallel_config)

        if int(B) == 1:
            partition = self._pipe_uniform(L, int(pp))
        else:
            # TODO(synk): pipe_ast dynamic-programming partitioner is not in the given
            # source; fall back to the uniform split.
            partition = self._pipe_uniform(L, int(pp))

        dp_const, pcount, ds_partition = self._dp_host(
            cluster_info, model_config, parallel_config, partition)

        return dict(rank_map=rank_map, ds_partition=ds_partition,
                    NL=NL, pp=int(pp), mp=int(m), pp_boundaries=int(pp) - 1,
                    base=base, coeff=coeff, mpavg_mean=mpavg_mean,
                    vol=vol, invbw_mean=invbw_mean,
                    dp_const=dp_const, pcount=pcount)

    # -------------------------------------------------------- one fused launch
    def _run_fused(self, preps):
        batch = len(preps)
        lane = _LANE
        sub = max(_SUB, _round_up(max(p['pp'] for p in preps), _SUB))

        mpavg = np.zeros((batch,), dtype=np.float32)
        base = np.zeros((batch, 1, lane), dtype=np.float32)
        coeff = np.zeros((batch, 1, lane), dtype=np.float32)
        vol = np.zeros((batch, 1, lane), dtype=np.float32)
        invbw = np.zeros((batch, sub, 1), dtype=np.float32)
        dpc = np.zeros((batch, sub, lane), dtype=np.float32)
        pcount = np.zeros((batch, sub, 1), dtype=np.float32)

        for i, p in enumerate(preps):
            NL, pp, mp = p['NL'], p['pp'], p['mp']
            assert NL <= lane and mp <= lane and pp <= sub
            mpavg[i] = p['mpavg_mean']
            base[i, 0, :NL] = p['base']
            coeff[i, 0, :NL] = p['coeff']
            vol[i, 0, :NL - 1] = p['vol']
            if pp > 1:
                invbw[i, :pp - 1, 0] = p['invbw_mean']
            dpc[i, :pp, :mp] = p['dp_const']
            pcount[i, :pp, 0] = p['pcount']

        return _fused_costs(mpavg, base, coeff, vol, invbw, dpc, pcount)

    # --------------------------------------------------------------- prediction
    def predict_single(self, config, bs, mbs, cluster_info, model_config, oth):
        prep = self._prepare_single(config, bs, mbs, cluster_info, model_config, oth)
        if prep is None:
            return None, None, jnp.asarray([float('inf')], dtype=jnp.float32)

        cost_e_b, cost_c_b, maxdp_b = self._run_fused([prep])
        NL, ppb = prep['NL'], prep['pp_boundaries']
        # cost_e / cost_c are consumed by the (missing) pipe_cost; keep them reachable.
        self._last_cost_e = cost_e_b[0, 0, :NL]                # (NL,)
        self._last_cost_c = cost_c_b[0, :ppb, :NL - 1].T       # (NL-1, pp-1)
        # TODO(synk): pipe_cost() is not provided in the given source; the pipeline
        # execution-time term is omitted and only the dp side cost is returned here.
        cost = maxdp_b[0, 0]                                   # shape (1,)
        return prep['rank_map'], prep['ds_partition'], cost

    def predict_multi(self, config, bs, mbs, cluster_info, model_config, oth):
        preps = [self._prepare_single(config[i], bs[i], mbs[i],
                                      cluster_info, model_config, oth[i])
                 for i in range(len(config))]
        n_cfg = len(preps)
        rank_maps = [None] * n_cfg
        partitions = [None] * n_cfg
        costs = [None] * n_cfg
        cost_es = [None] * n_cfg
        cost_cs = [None] * n_cfg

        valid = [i for i, p in enumerate(preps) if p is not None]
        if valid:
            # single batched launch; grid axis sharded across TCs on v7x
            cost_e_b, cost_c_b, maxdp_b = self._run_fused([preps[i] for i in valid])
            for slot, i in enumerate(valid):
                p = preps[i]
                NL, ppb = p['NL'], p['pp_boundaries']
                rank_maps[i] = p['rank_map']
                partitions[i] = p['ds_partition']
                cost_es[i] = cost_e_b[slot, 0, :NL]
                cost_cs[i] = cost_c_b[slot, :ppb, :NL - 1].T
                costs[i] = maxdp_b[slot, 0]
        for i in range(n_cfg):
            if preps[i] is None:
                costs[i] = jnp.asarray([float('inf')], dtype=jnp.float32)

        self._last_cost_e = cost_es
        self._last_cost_c = cost_cs
        return rank_maps, partitions, jnp.concatenate(costs)

    def __call__(self, args):
        config, bs, micro_bs, cluster_info, model_config, oth = args
        if isinstance(bs, list):
            return self.predict_multi(config, bs, micro_bs, cluster_info,
                                      model_config, oth)
        else:
            assert isinstance(bs, int)
            return self.predict_single(config, bs, micro_bs, cluster_info,
                                       model_config, oth)


# ----------------------------------------------------------------------------
if __name__ == "__main__":
    n_layers = 8
    model_config = {
        'hidden_size': 32.0,
        'sequence_length': 8.0,
        'num_layers': float(n_layers),
        'vocab_size': 64.0,
        'type': 'gpt2',
    }

    amp = AMPPallas(model_config, exp_name='synthetic', placement=True)

    # 2 nodes x 4 GPUs each = 8 ranks; mp=2, dp=2, pp=2
    M, N = 4, 2
    config = -np.ones((M, N), dtype=np.float32)                 # all -1 -> default rank map
    cluster_info = {0: [1.0e10, 5.0e10], 1: [1.2e10, 4.0e10]}   # [inter_bw, intra_bw]
    oth = {'mp_deg': 2.0, 'dp_deg': 2.0, 'pp_deg': 2.0}
    bs, mbs = 4, 2                                              # B = bs/(dp*mbs) = 1

    # single prediction -> one fused Pallas launch (grid=(1,))
    rank_map, ds_partition, cost = amp((config, bs, mbs, cluster_info,
                                        model_config, oth))
    jax.block_until_ready(cost)
    jax.block_until_ready(amp._last_cost_e)
    jax.block_until_ready(amp._last_cost_c)

    # batched prediction -> one fused Pallas launch (grid=(2,), parallel axis)
    rank_maps, partitions, costs = amp(([config, config], [bs, bs], [mbs, mbs],
                                        cluster_info, model_config, [oth, oth]))
    jax.block_until_ready(costs)

    print("KERNEL_OK")
</pallas_src>

<mosaic_0001>
module attributes {stable_mosaic.version = 11 : i64} {
  func.func @_fused_cost_kernel(%arg0: i32, %arg1: memref<1xf32, #tpu.memory_space<smem>>, %arg2: memref<1x1x128xf32, #tpu.memory_space<vmem>>, %arg3: memref<1x1x128xf32, #tpu.memory_space<vmem>>, %arg4: memref<1x1x128xf32, #tpu.memory_space<vmem>>, %arg5: memref<1x8x1xf32, #tpu.memory_space<vmem>>, %arg6: memref<1x8x128xf32, #tpu.memory_space<vmem>>, %arg7: memref<1x8x1xf32, #tpu.memory_space<vmem>>, %arg8: memref<1x1x128xf32, #tpu.memory_space<vmem>>, %arg9: memref<1x8x128xf32, #tpu.memory_space<vmem>>, %arg10: memref<1x1x1xf32, #tpu.memory_space<vmem>>) attributes {dimension_semantics = [#tpu.dimension_semantics<parallel>], iteration_bounds = array<i64: 1>, scalar_prefetch = 0 : i64, scratch_operands = 0 : i64, tpu.core_type = #tpu.core_type<tc>, window_params = [{transform_indices = @transform_0, window_bounds = array<i64: 1>}, {transform_indices = @transform_1, window_bounds = array<i64: 1, 1, 128>}, {transform_indices = @transform_2, window_bounds = array<i64: 1, 1, 128>}, {transform_indices = @transform_3, window_bounds = array<i64: 1, 1, 128>}, {transform_indices = @transform_4, window_bounds = array<i64: 1, 8, 1>}, {transform_indices = @transform_5, window_bounds = array<i64: 1, 8, 128>}, {transform_indices = @transform_6, window_bounds = array<i64: 1, 8, 1>}, {transform_indices = @transform_7, window_bounds = array<i64: 1, 1, 128>}, {transform_indices = @transform_8, window_bounds = array<i64: 1, 8, 128>}, {transform_indices = @transform_9, window_bounds = array<i64: 1, 1, 1>}]} {
    %0 = arith.index_cast %arg0 : i32 to index
    %1 = memref.load %arg1[%0] : memref<1xf32, #tpu.memory_space<smem>>
    %c0 = arith.constant 0 : index
    %c0_0 = arith.constant 0 : index
    %c0_1 = arith.constant 0 : index
    %2 = vector.load %arg2[%c0, %c0_0, %c0_1] : memref<1x1x128xf32, #tpu.memory_space<vmem>>, vector<1x1x128xf32>
    %3 = vector.shape_cast %2 : vector<1x1x128xf32> to vector<1x128xf32>
    %c0_2 = arith.constant 0 : index
    %c0_3 = arith.constant 0 : index
    %c0_4 = arith.constant 0 : index
    %4 = vector.load %arg3[%c0_2, %c0_3, %c0_4] : memref<1x1x128xf32, #tpu.memory_space<vmem>>, vector<1x1x128xf32>
    %5 = vector.shape_cast %4 : vector<1x1x128xf32> to vector<1x128xf32>
    %6 = vector.broadcast %1 : f32 to vector<1x128xf32>
    %7 = arith.mulf %5, %6 : vector<1x128xf32>
    %8 = arith.addf %3, %7 : vector<1x128xf32>
    %c0_5 = arith.constant 0 : index
    %c0_6 = arith.constant 0 : index
    %c0_7 = arith.constant 0 : index
    %9 = vector.load %arg8[%c0_5, %c0_6, %c0_7] : memref<1x1x128xf32, #tpu.memory_space<vmem>>, vector<1x1x128xf32>
    %10 = vector.shape_cast %9 : vector<1x1x128xf32> to vector<1x128xf32>
    %11 = vector.shape_cast %8 : vector<1x128xf32> to vector<1x1x128xf32>
    tpu.vector_store %arg8[%c0_5, %c0_6, %c0_7], %11 {strides = array<i32>} : memref<1x1x128xf32, #tpu.memory_space<vmem>>, vector<1x1x128xf32>,
    %c0_8 = arith.constant 0 : index
    %c0_9 = arith.constant 0 : index
    %c0_10 = arith.constant 0 : index
    %12 = vector.load %arg5[%c0_8, %c0_9, %c0_10] : memref<1x8x1xf32, #tpu.memory_space<vmem>>, vector<1x8x1xf32>
    %13 = vector.shape_cast %12 : vector<1x8x1xf32> to vector<8x1xf32>
    %c0_11 = arith.constant 0 : index
    %c0_12 = arith.constant 0 : index
    %c0_13 = arith.constant 0 : index
    %14 = vector.load %arg4[%c0_11, %c0_12, %c0_13] : memref<1x1x128xf32, #tpu.memory_space<vmem>>, vector<1x1x128xf32>
    %15 = vector.shape_cast %14 : vector<1x1x128xf32> to vector<1x128xf32>
    %16 = vector.broadcast %13 : vector<8x1xf32> to vector<8x128xf32>
    %17 = vector.broadcast %15 : vector<1x128xf32> to vector<8x128xf32>
    %18 = arith.mulf %16, %17 : vector<8x128xf32>
    %c0_14 = arith.constant 0 : index
    %c0_15 = arith.constant 0 : index
    %c0_16 = arith.constant 0 : index
    %19 = vector.load %arg9[%c0_14, %c0_15, %c0_16] : memref<1x8x128xf32, #tpu.memory_space<vmem>>, vector<1x8x128xf32>
    %20 = vector.shape_cast %19 : vector<1x8x128xf32> to vector<8x128xf32>
    %21 = vector.shape_cast %18 : vector<8x128xf32> to vector<1x8x128xf32>
    tpu.vector_store %arg9[%c0_14, %c0_15, %c0_16], %21 {strides = array<i32>} : memref<1x8x128xf32, #tpu.memory_space<vmem>>, vector<1x8x128xf32>,
    %c0_17 = arith.constant 0 : index
    %c0_18 = arith.constant 0 : index
    %c0_19 = arith.constant 0 : index
    %22 = vector.load %arg6[%c0_17, %c0_18, %c0_19] : memref<1x8x128xf32, #tpu.memory_space<vmem>>, vector<1x8x128xf32>
    %23 = vector.shape_cast %22 : vector<1x8x128xf32> to vector<8x128xf32>
    %c0_20 = arith.constant 0 : index
    %c0_21 = arith.constant 0 : index
    %c0_22 = arith.constant 0 : index
    %24 = vector.load %arg7[%c0_20, %c0_21, %c0_22] : memref<1x8x1xf32, #tpu.memory_space<vmem>>, vector<1x8x1xf32>
    %25 = vector.shape_cast %24 : vector<1x8x1xf32> to vector<8x1xf32>
    %26 = vector.broadcast %25 : vector<8x1xf32> to vector<8x128xf32>
    %27 = arith.mulf %23, %26 : vector<8x128xf32>
    %cst = arith.constant 0.000000e+00 : f32
    %28 = vector.broadcast %cst : f32 to vector<8x128xf32>
    %29 = arith.maximumf %27, %28 : vector<8x128xf32>
    %30 = vector.shape_cast %29 : vector<8x128xf32> to vector<1x8x128xf32>
    %cst_23 = arith.constant dense<0xFF800000> : vector<1xf32>
    %31 = vector.multi_reduction <maximumf>, %30, %cst_23 [1, 2] : vector<1x8x128xf32> to vector<1xf32>
    %32 = vector.shape_cast %31 : vector<1xf32> to vector<1x1x1xf32>
    %33 = vector.extract %32[0, 0, 0] : f32 from vector<1x1x1xf32>
    %34 = vector.broadcast %33 : f32 to vector<1x1xf32>
    %c0_24 = arith.constant 0 : index
    %c0_25 = arith.constant 0 : index
    %c0_26 = arith.constant 0 : index
    %35 = vector.load %arg10[%c0_24, %c0_25, %c0_26] : memref<1x1x1xf32, #tpu.memory_space<vmem>>, vector<1x1x1xf32>
    %36 = vector.shape_cast %35 : vector<1x1x1xf32> to vector<1x1xf32>
    %37 = vector.shape_cast %34 : vector<1x1xf32> to vector<1x1x1xf32>
    tpu.vector_store %arg10[%c0_24, %c0_25, %c0_26], %37 {strides = array<i32>} : memref<1x1x1xf32, #tpu.memory_space<vmem>>, vector<1x1x1xf32>,
    return
  }
  func.func @transform_0(%arg0: i32) -> i32 {
    %c0_i32 = arith.constant 0 : i32
    %c0_i32_0 = arith.constant 0 : i32
    return %c0_i32 : i32
  }
  func.func @transform_1(%arg0: i32) -> (i32, i32, i32) {
    %c0_i32 = arith.constant 0 : i32
    %c0_i32_0 = arith.constant 0 : i32
    %c0_i32_1 = arith.constant 0 : i32
    return %arg0, %c0_i32, %c0_i32_0 : i32, i32, i32
  }
  func.func @transform_2(%arg0: i32) -> (i32, i32, i32) {
    %c0_i32 = arith.constant 0 : i32
    %c0_i32_0 = arith.constant 0 : i32
    %c0_i32_1 = arith.constant 0 : i32
    return %arg0, %c0_i32, %c0_i32_0 : i32, i32, i32
  }
  func.func @transform_3(%arg0: i32) -> (i32, i32, i32) {
    %c0_i32 = arith.constant 0 : i32
    %c0_i32_0 = arith.constant 0 : i32
    %c0_i32_1 = arith.constant 0 : i32
    return %arg0, %c0_i32, %c0_i32_0 : i32, i32, i32
  }
  func.func @transform_4(%arg0: i32) -> (i32, i32, i32) {
    %c0_i32 = arith.constant 0 : i32
    %c0_i32_0 = arith.constant 0 : i32
    %c0_i32_1 = arith.constant 0 : i32
    return %arg0, %c0_i32, %c0_i32_0 : i32, i32, i32
  }
  func.func @transform_5(%arg0: i32) -> (i32, i32, i32) {
    %c0_i32 = arith.constant 0 : i32
    %c0_i32_0 = arith.constant 0 : i32
    %c0_i32_1 = arith.constant 0 : i32
    return %arg0, %c0_i32, %c0_i32_0 : i32, i32, i32
  }
  func.func @transform_6(%arg0: i32) -> (i32, i32, i32) {
    %c0_i32 = arith.constant 0 : i32
    %c0_i32_0 = arith.constant 0 : i32
    %c0_i32_1 = arith.constant 0 : i32
    return %arg0, %c0_i32, %c0_i32_0 : i32, i32, i32
  }
  func.func @transform_7(%arg0: i32) -> (i32, i32, i32) {
    %c0_i32 = arith.constant 0 : i32
    %c0_i32_0 = arith.constant 0 : i32
    %c0_i32_1 = arith.constant 0 : i32
    return %arg0, %c0_i32, %c0_i32_0 : i32, i32, i32
  }
  func.func @transform_8(%arg0: i32) -> (i32, i32, i32) {
    %c0_i32 = arith.constant 0 : i32
    %c0_i32_0 = arith.constant 0 : i32
    %c0_i32_1 = arith.constant 0 : i32
    return %arg0, %c0_i32, %c0_i32_0 : i32, i32, i32
  }
  func.func @transform_9(%arg0: i32) -> (i32, i32, i32) {
    %c0_i32 = arith.constant 0 : i32
    %c0_i32_0 = arith.constant 0 : i32
    %c0_i32_1 = arith.constant 0 : i32
    return %arg0, %c0_i32, %c0_i32_0 : i32, i32, i32
  }
}

</mosaic_0001>

<bundles_post_ra>
// kernel: _fused_costs.1
= control target key start
LH: loop header
LB: loop body
LE: loop exit
PB: predicated region body
PF: predicated region fallthrough
CT: control target
= control target key end

     0   :  { %16 = vsyncpa [#allocation4], 0  ;;  %s306_s0 = inlined_call_operand.<no memory space> [shape: f32[1], index: 0, kind: input, shape index: {}]   ;;  %s307_s1 = inlined_call_operand.vmem [shape: f32[1,1,128], index: 1, kind: input, shape index: {}]   ;;  %s308_s2 = inlined_call_operand.vmem [shape: f32[1,1,128], index: 2, kind: input, shape index: {}]   ;;  %s309_s3 = inlined_call_operand.vmem [shape: f32[1,1,128], index: 3, kind: input, shape index: {}]   ;;  %s310_s4 = inlined_call_operand.vmem [shape: f32[1,8,1], index: 4, kind: input, shape index: {}]   ;;  %s311_s5 = inlined_call_operand.vmem [shape: f32[1,8,128], index: 5, kind: input, shape index: {}]   ;;  %s312_s6 = inlined_call_operand.vmem [shape: f32[1,8,1], index: 6, kind: input, shape index: {}]   ;;  %s313_s7 = inlined_call_operand.hbm [shape: f32[1,1,128], index: 7, kind: output, shape index: {0}]   ;;  %s314_s8 = inlined_call_operand.hbm [shape: f32[1,8,128], index: 8, kind: output, shape index: {1}]   ;;  %s315_s9 = inlined_call_operand.hbm [shape: f32[1,1,1], index: 9, kind: output, shape index: {2}]  }
   0x1   :  { %v55_v0 = vld [vmem:[%s312_s6] sm:$0xff] }
   0x2   :  { %17 = vsyncpa [#allocation6], 0  ;;  %v195_v1 = vmov 0   ;;  %v39_v2 = vld [vmem:[%s310_s4] sm:$0xff]  ;;  %v35_v11 = vstv %s306_s0  ;;  %s196_s20 = smov [#allocation5]  }
   0x3   :  { %123 = vset.pattern.permute.xlu0 %v195_v1  ;;  %124 = vset.pattern.permute.xlu1 %v195_v1  ;;  %v54_v3 = vld [vmem:[%s311_s5] sm:$0xff]  ;;  %s91_s21 = sshll.u32 %s196_s20, 4  ;;  %s92_s21 = int_to_ptr.vmem [resolvable:$true] %s91_s21 }
   0x4   :  { %58 = vperm.xlu0 %123, %v55_v0   ;;  %43 = vperm.xlu1 %124, %v39_v2   ;;  %v116_v7 = vld [vmem:[%s309_s3] ss:$0 sm:$0xff]  ;;  %s197_s3 = smov [#allocation3]   ;;  %s125_s23 = scalar_lea.vmem %s92_s21, 128 }
   0x5   :  { %v34_v10 = vld [vmem:[%s308_s2] sm:$0x1]  ;;  %s81_s22 = sshll.u32 %s197_s3, 4  ;;  %p126_p0 = scmp.ne.s32.totalorder %s92_s21, %s125_s23  ;;  %s82_s22 = int_to_ptr.vmem [resolvable:$true] %s81_s22 }
   0x6   :  { %v36_v12 = vmul.f32 %v35_v11, %v34_v10  ;;  %v33_v13 = vld [vmem:[%s307_s1] sm:$0x1]  ;;  %p130_p1 = scmp.lt.s32.totalorder %s92_s21, %s92_s21  ;;  %p131_p2 = scmp.lt.s32.totalorder %s125_s23, %s125_s23 }
   0x8   :  { %v37_v14 = vadd.f32 %v36_v12, %v33_v13  ;;  %p132_p3 = por %p131_p2, %p130_p1 }
   0xa   :  { %p133_p4 = pnand %p132_p3, %p126_p0 }
  0x83   :  { %v59_v4 = vpop.permute.xlu0 %58  ;;  %v44_v8 = vpop.permute.xlu1 %43 }
  0x84   :  { %v61_v5 = vmul.f32 %v59_v4, %v54_v3  ;;  %v52_v9 = vmul.f32 %v116_v7, %v44_v8 }
  0x86   :  { %v62_v6 = vmax.f32 %v61_v5, 0.0  ;;  %53 = vst [vmem:[#allocation5] sm:$0xff] %v52_v9 }
  0x88   :  { %63 = vmax.xlane.f32.xlu0 %v62_v6 }
  0x89   :  { %136 = shalt.err (!%p133_p4)
}
  0x8a   :  { %s137_s24 = scalar_lea.hbm %s314_s8, 128 }
  0x8b   :  { %p138_p5 = scmp.ne.s32.totalorder %s314_s8, %s137_s24  ;;  %p141_p6 = scmp.lt.u32.totalorder %s137_s24, %s314_s8 }
  0x8d   :  { %p143_p7 = pnand %p141_p6, %p138_p5 }
  0x8f   :  { %146 = shalt.err (!%p143_p7)
}
  0x90   :  { %94 = dma.vmem_to_hbm [thread:$0]  %s92_s21, 128, %s314_s8, [#allocation6]   ;;  %38 = vst [vmem:[#allocation3] sm:$0x1] %v37_v14 }
  0x91   :  { %s147_s30 = scalar_lea.vmem %s82_s22, 16  ;;  %s151_s10 = scalar_lea.vmem %s82_s22, 32 }
  0x92   :  { %p148_p8 = scmp.ne.s32.totalorder %s82_s22, %s147_s30  ;;  %p152_p9 = scmp.lt.s32.totalorder %s82_s22, %s82_s22 }
  0x93   :  { %p153_p10 = scmp.lt.s32.totalorder %s151_s10, %s147_s30 }
  0x95   :  { %p154_p11 = por %p153_p10, %p152_p9 }
  0x97   :  { %p155_p12 = pnand %p154_p11, %p148_p8 }
  0x99   :  { %158 = shalt.err (!%p155_p12)
}
  0x9a   :  { %s159_s13 = scalar_lea.hbm %s313_s7, 16 }
  0x9b   :  { %p160_p13 = scmp.ne.s32.totalorder %s313_s7, %s159_s13  ;;  %p163_p0 = scmp.lt.u32.totalorder %s159_s13, %s313_s7 }
  0x9d   :  { %p165_p1 = pnand %p163_p0, %p160_p13 }
  0x9f   :  { %168 = shalt.err (!%p165_p1)
}
  0xa0   :  { %84 = dma.vmem_to_hbm [thread:$0]  %s82_s22, 16, %s313_s7, [#allocation4]   ;;  %vm73_vm0 = vcmask 0  }
  0xa1   :  { %s198_s4 = smov [#allocation7]  }
  0xa2   :  { %s101_s18 = sshll.u32 %s198_s4, 4  ;;  %s102_s18 = int_to_ptr.vmem [resolvable:$true] %s101_s18 }
  0xa3   :  { %s169_s19 = scalar_lea.vmem %s102_s18, 16  ;;  %s173_s20 = scalar_lea.vmem %s102_s18, 32 }
  0xa4   :  { %p170_p2 = scmp.ne.s32.totalorder %s102_s18, %s169_s19  ;;  %p174_p3 = scmp.lt.s32.totalorder %s102_s18, %s102_s18 }
  0xa5   :  { %p175_p4 = scmp.lt.s32.totalorder %s173_s20, %s169_s19 }
  0xa7   :  { %p176_p5 = por %p175_p4, %p174_p3 }
  0xa9   :  { %p177_p6 = pnand %p176_p5, %p170_p2 }
 0x115   :  { %v64_v15 = vpop.xlane.xlu0 %63 }
 0x116   :  { %v65_v16 = vrot.slane %v64_v15, 4 }
 0x118   :  { %v66_v17 = vmax.f32 %v64_v15, %v65_v16 }
 0x11a   :  { %v67_v18 = vrot.slane %v66_v17, 2 }
 0x11c   :  { %v68_v19 = vmax.f32 %v66_v17, %v67_v18 }
 0x11e   :  { %v69_v20 = vrot.slane %v68_v19, 1 }
 0x120   :  { %v70_v21 = vmax.f32 %v68_v19, %v69_v20 }
 0x122   :  { %117 = vpush %v70_v21 }
 0x153   :  { %s118_s5 = spop %117 }
 0x154   :  { %v72_v22 = vstv %s118_s5 }
 0x155   :  { %74 = vst.msk [vmem:[#allocation7] sm:$0x1] %vm73_vm0, %v72_v22 }
 0x156   :  { %180 = shalt.err (!%p177_p6)
}
 0x157   :  { %s181_s3 = scalar_lea.hbm %s315_s9, 16 }
 0x158   :  { %p182_p7 = scmp.ne.s32.totalorder %s315_s9, %s181_s3  ;;  %p185_p8 = scmp.lt.u32.totalorder %s181_s3, %s315_s9 }
 0x15a   :  { %p187_p9 = pnand %p185_p8, %p182_p7 }
 0x15c   :  { %190 = shalt.err (!%p187_p9)
}
 0x15d   :  { %104 = dma.vmem_to_hbm [thread:$0]  %s102_s18, 16, %s315_s9, [#allocation6]  }
 0x15e   :  { %191 = dma.done.wait [#allocation4], 16  }
 0x15f   :  { %192 = vsyncadd [#allocation4], 4294967280 }
 0x160   :  { %193 = dma.done.wait [#allocation6], 144  }
 0x161   :  { %194 = vsyncadd [#allocation6], 4294967152 }
 0x162   :  { %114 = vsyncpa [#allocation4], 1 }
 0x163   :  { %115 = vsyncpa [#allocation6], 1 }

</bundles_post_ra>
